<compile_context>
chip_gen: v6e
topology: v6e:2x2x1
jax: 0.10.0
libtpu: 0.0.40
codegen_flags: <defaults>
</compile_context>

<pallas_src>
import functools
import math

import jax
import jax.numpy as jnp
from jax import lax
from jax.experimental import pallas as pl
from jax.experimental.pallas import tpu as pltpu


def _lovasz_hinge_kernel(err_ref, lab_ref, out_ref, *, cb, rb, n_jb):
    """One grid step = one (image b, row-block ib) partial loss.

    err_ref : (1, 1, P) f32  hinge errors of the whole (padded) image
    lab_ref : (1, 1, P) f32  binary labels of the whole (padded) image
    out_ref : (1, 1, 8, 128) f32  partial loss of this row block (broadcast)
    """
    i0 = pl.multiple_of(pl.program_id(1) * rb, rb)

    # Lane-dense row of errors / labels owned by this grid step.
    e_i = err_ref[0, :, pl.ds(i0, rb)]                    # (1, rb)
    lab_i = lab_ref[0, :, pl.ds(i0, rb)]                  # (1, rb)

    # Hoisted iotas / constants (review: do not rebuild (cb, rb) index arrays
    # per block; shift only the small (1, rb) side inside the loop).
    lane_iota = lax.broadcasted_iota(jnp.int32, (1, rb), 1)
    sub_iota = lax.broadcasted_iota(jnp.int32, (cb, 1), 0)
    ones_bf = jnp.ones((1, cb), dtype=jnp.bfloat16)

    def j_body(jb, carry):
        rank_acc, cge_acc, gts_acc = carry
        j0 = pl.multiple_of(jb * cb, cb)
        e_j_row = err_ref[0, :, pl.ds(j0, cb)]            # (1, cb)
        lab_j = lab_ref[0, :, pl.ds(j0, cb)]              # (1, cb)
        e_j = jnp.transpose(e_j_row)                      # (cb, 1) sublane-varying

        # mask[s, l] == 1  iff element (j0+s) sorts strictly before (i0+l) in
        # the stable descending sort: error greater, or equal with smaller idx.
        gt = e_j > e_i
        eq = e_j == e_i
        tie = sub_iota < (lane_iota + (i0 - j0))
        mask = jnp.logical_or(gt, jnp.logical_and(eq, tie)).astype(jnp.bfloat16)

        # Shared (cb, rb) RHS, two M=1 bf16 matmuls with exact f32 accumulation
        # (0/1 values -> exact integer counts for P < 2^24).
        rank_acc = rank_acc + jnp.dot(ones_bf, mask,
                                      preferred_element_type=jnp.float32)
        cge_acc = cge_acc + jnp.dot(lab_j.astype(jnp.bfloat16), mask,
                                    preferred_element_type=jnp.float32)
        gts_acc = gts_acc + jnp.sum(lab_j, axis=1, keepdims=True)
        return rank_acc, cge_acc, gts_acc

    carry0 = (jnp.zeros((1, rb), jnp.float32),
              jnp.zeros((1, rb), jnp.float32),
              jnp.zeros((1, 1), jnp.float32))
    rank, cge, gts = lax.fori_loop(0, n_jb, j_body, carry0,
                                   unroll=min(2, n_jb))
    # rank : 0-based descending-stable-sort position of each element (exact int)
    # cge  : number of positive labels sorted strictly before each element
    # gts  : total positives (padded lanes have label 0 => unaffected)

    # lovasz_grad evaluated at each element's own sorted position (fused
    # epilogue: errors_sorted / gt_sorted never materialized).
    cgt = cge + lab_i                      # inclusive cumsum of gt at position rank
    pos = rank + 1.0
    jac = 1.0 - (gts - cgt) / (gts + pos - cgt)
    jac_prev = 1.0 - (gts - cge) / (gts + rank - cge)      # nan only when rank==0
    grad = jac - jnp.where(rank >= 1.0, jac_prev, 0.0)     # select discards nan

    loss_part = jnp.sum(jnp.maximum(e_i, 0.0) * grad)
    out_ref[...] = jnp.broadcast_to(loss_part, out_ref.shape).astype(out_ref.dtype)


def _round_up(x, m):
    return ((x + m - 1) // m) * m


def lovasz_hinge_loss(pred, target):
    """Mean per-image Lovasz hinge loss. pred/target: [B,1,H,W] or [B,H,W]."""
    B = pred.shape[0]
    P = int(math.prod(pred.shape[1:]))

    logits = pred.astype(jnp.float32).reshape(B, P)
    labels = target.astype(jnp.float32).reshape(B, P)
    # Hinge errors: cheap O(B*P) elementwise prologue.
    errors = 1.0 - logits * (2.0 * labels - 1.0)

    # ---- generation-aware block sizes / padding ---------------------------
    try:
        vmem_cap = int(pltpu.get_tpu_info().vmem_capacity_bytes)
    except Exception:            # non-TPU / older runtime: be conservative (v7x)
        vmem_cap = 64 << 20

    cb = 256                               # contraction (j) block, sublane axis
    rb = 256 if P <= 256 else 512          # output (i) block, lane axis
    P_pad = _round_up(P, max(rb, cb))
    if vmem_cap >= (96 << 20) and P_pad % 1024 == 0:
        rb = 1024                          # bigger i-blocks on 128 MiB parts
    n_ib = P_pad // rb
    n_jb = P_pad // cb

    if P_pad != P:
        # Padded elements: error = -1e30 (sorts last, relu()==0 -> exactly 0
        # contribution), label = 0 (gts and all real cumsums unchanged).
        errors = jnp.pad(errors, ((0, 0), (0, P_pad - P)), constant_values=-1e30)
        labels = jnp.pad(labels, ((0, 0), (0, P_pad - P)), constant_values=0.0)

    errors = errors.reshape(B, 1, P_pad)
    labels = labels.reshape(B, 1, P_pad)

    # ---- VMEM budget ------------------------------------------------------
    in_bufs = 2 * 2 * (8 * P_pad * 4)         # 2 inputs, double-buffered, 8-sublane pad
    transient = 12 * cb * rb * 4 + (2 << 20)  # mask-building temporaries + slack
    need = in_bufs + transient + 2 * (8 * 128 * 4)
    vmem_limit = int(min(int(vmem_cap * 0.9), max(32 << 20, need + (4 << 20))))

    cost = pl.CostEstimate(
        flops=int(10.0 * B * float(P_pad) * float(P_pad)),
        transcendentals=0,
        bytes_accessed=int(B * P_pad * 4 * 2 + B * n_ib * 8 * 128 * 4),
    )

    kernel = functools.partial(_lovasz_hinge_kernel, cb=cb, rb=rb, n_jb=n_jb)
    out = pl.pallas_call(
        kernel,
        out_shape=jax.ShapeDtypeStruct((B, n_ib, 8, 128), jnp.float32),
        grid_spec=pltpu.PrefetchScalarGridSpec(
            num_scalar_prefetch=0,
            grid=(B, n_ib),
            in_specs=[
                pl.BlockSpec((1, 1, P_pad), lambda b, i: (b, 0, 0)),
                pl.BlockSpec((1, 1, P_pad), lambda b, i: (b, 0, 0)),
            ],
            out_specs=pl.BlockSpec((1, 1, 8, 128), lambda b, i: (b, i, 0, 0)),
        ),
        compiler_params=pltpu.CompilerParams(
            dimension_semantics=("parallel", "parallel"),
            vmem_limit_bytes=vmem_limit,
        ),
        cost_estimate=cost,
    )(errors, labels)

    per_image = jnp.sum(out[:, :, 0, 0], axis=1)   # sum of row-block partials
    return jnp.mean(per_image)


def _lovasz_hinge_ref(pred, target):
    """Pure-JAX reference (per_image=True semantics of the PyTorch module)."""
    B = pred.shape[0]
    logits = pred.astype(jnp.float32).reshape(B, -1)
    labels = target.astype(jnp.float32).reshape(B, -1)

    def per_image(lg, lb):
        signs = 2.0 * lb - 1.0
        errors = 1.0 - lg * signs
        order = jnp.argsort(-errors)
        errors_sorted = errors[order]
        gt_sorted = lb[order]
        gts = gt_sorted.sum()
        inter = gts - jnp.cumsum(gt_sorted)
        union = gts + jnp.cumsum(1.0 - gt_sorted)
        jac = 1.0 - inter / union
        grad = jnp.concatenate([jac[:1], jac[1:] - jac[:-1]])
        return jnp.dot(jnp.maximum(errors_sorted, 0.0), grad)

    return jnp.mean(jax.vmap(per_image)(logits, labels))


if __name__ == "__main__":
    key = jax.random.PRNGKey(0)
    k1, k2 = jax.random.split(key)
    B, C, H, W = 2, 1, 16, 16
    pred = jax.random.normal(k1, (B, C, H, W), dtype=jnp.float32)
    target = (jax.random.uniform(k2, (B, C, H, W)) > 0.5).astype(jnp.float32)

    loss = lovasz_hinge_loss(pred, target)
    jax.block_until_ready(loss)

    ref = _lovasz_hinge_ref(pred, target)
    assert abs(float(loss) - float(ref)) < 1e-4, (float(loss), float(ref))
    print("KERNEL_OK")
</pallas_src>

<mosaic_0001>
module attributes {stable_mosaic.version = 11 : i64} {
  func.func @_lovasz_hinge_kernel(%arg0: i32, %arg1: i32, %arg2: memref<1x1x256xf32, #tpu.memory_space<vmem>>, %arg3: memref<1x1x256xf32, #tpu.memory_space<vmem>>, %arg4: memref<1x1x8x128xf32, #tpu.memory_space<vmem>>) attributes {dimension_semantics = [#tpu.dimension_semantics<parallel>, #tpu.dimension_semantics<parallel>], iteration_bounds = array<i64: 2, 1>, scalar_prefetch = 0 : i64, scratch_operands = 0 : i64, tpu.core_type = #tpu.core_type<tc>, window_params = [{transform_indices = @transform_0, window_bounds = array<i64: 1, 1, 256>}, {transform_indices = @transform_1, window_bounds = array<i64: 1, 1, 256>}, {transform_indices = @transform_2, window_bounds = array<i64: 1, 1, 8, 128>}]} {
    %c256_i32 = arith.constant 256 : i32
    %0 = arith.muli %arg1, %c256_i32 : i32
    %1 = tpu.assume_multiple %0, 256 : i32
    %c0 = arith.constant 0 : index
    %c0_0 = arith.constant 0 : index
    %2 = arith.index_cast %1 : i32 to index
    %3 = vector.load %arg2[%c0, %c0_0, %2] : memref<1x1x256xf32, #tpu.memory_space<vmem>>, vector<1x1x256xf32>
    %4 = vector.shape_cast %3 : vector<1x1x256xf32> to vector<1x256xf32>
    %c0_1 = arith.constant 0 : index
    %c0_2 = arith.constant 0 : index
    %5 = arith.index_cast %1 : i32 to index
    %6 = vector.load %arg3[%c0_1, %c0_2, %5] : memref<1x1x256xf32, #tpu.memory_space<vmem>>, vector<1x1x256xf32>
    %7 = vector.shape_cast %6 : vector<1x1x256xf32> to vector<1x256xf32>
    %8 = tpu.iota {dimensions = array<i32: 1>} : vector<1x256xi32>
    %9 = tpu.iota {dimensions = array<i32: 0>} : vector<256x1xi32>
    %cst = arith.constant 1.000000e+00 : bf16
    %10 = vector.broadcast %cst : bf16 to vector<1x256xbf16>
    %cst_3 = arith.constant 0.000000e+00 : f32
    %11 = vector.broadcast %cst_3 : f32 to vector<1x256xf32>
    %cst_4 = arith.constant 0.000000e+00 : f32
    %12 = vector.broadcast %cst_4 : f32 to vector<1x256xf32>
    %cst_5 = arith.constant 0.000000e+00 : f32
    %13 = vector.broadcast %cst_5 : f32 to vector<1x1xf32>
    %c0_i32 = arith.constant 0 : i32
    %c256_i32_6 = arith.constant 256 : i32
    %14 = arith.muli %c0_i32, %c256_i32_6 : i32
    %15 = tpu.assume_multiple %14, 256 : i32
    %c0_7 = arith.constant 0 : index
    %c0_8 = arith.constant 0 : index
    %16 = arith.index_cast %15 : i32 to index
    %17 = vector.load %arg2[%c0_7, %c0_8, %16] : memref<1x1x256xf32, #tpu.memory_space<vmem>>, vector<1x1x256xf32>
    %18 = vector.shape_cast %17 : vector<1x1x256xf32> to vector<1x256xf32>
    %c0_9 = arith.constant 0 : index
    %c0_10 = arith.constant 0 : index
    %19 = arith.index_cast %15 : i32 to index
    %20 = vector.load %arg3[%c0_9, %c0_10, %19] : memref<1x1x256xf32, #tpu.memory_space<vmem>>, vector<1x1x256xf32>
    %21 = vector.shape_cast %20 : vector<1x1x256xf32> to vector<1x256xf32>
    %22 = tpu.transpose %18, [1, 0] : vector<1x256xf32> -> vector<256x1xf32>
    %23 = vector.broadcast %22 : vector<256x1xf32> to vector<256x256xf32>
    %24 = vector.broadcast %4 : vector<1x256xf32> to vector<256x256xf32>
    %25 = arith.cmpf ogt, %23, %24 : vector<256x256xf32>
    %26 = vector.broadcast %22 : vector<256x1xf32> to vector<256x256xf32>
    %27 = vector.broadcast %4 : vector<1x256xf32> to vector<256x256xf32>
    %28 = arith.cmpf oeq, %26, %27 : vector<256x256xf32>
    %29 = arith.subi %1, %15 : i32
    %30 = vector.broadcast %29 : i32 to vector<1x256xi32>
    %31 = arith.addi %8, %30 : vector<1x256xi32>
    %32 = vector.broadcast %9 : vector<256x1xi32> to vector<256x256xi32>
    %33 = vector.broadcast %31 : vector<1x256xi32> to vector<256x256xi32>
    %34 = arith.cmpi slt, %32, %33 : vector<256x256xi32>
    %35 = arith.andi %28, %34 : vector<256x256xi1>
    %36 = arith.ori %25, %35 : vector<256x256xi1>
    %37 = arith.extui %36 : vector<256x256xi1> to vector<256x256xi32>
    %38 = arith.sitofp %37 : vector<256x256xi32> to vector<256x256xf32>
    %39 = arith.truncf %38 : vector<256x256xf32> to vector<256x256xbf16>
    %cst_11 = arith.constant dense<0.000000e+00> : vector<1x256xf32>
    %40 = tpu.matmul %10, %39, %cst_11 {dimension_numbers = #tpu.dot_dimension_numbers<[1], [0], [0], [1], [0, 0, 1, 1], [], []>} : vector<1x256xbf16>, vector<256x256xbf16>, vector<1x256xf32> -> vector<1x256xf32>
    %41 = arith.addf %11, %40 : vector<1x256xf32>
    %42 = arith.truncf %21 : vector<1x256xf32> to vector<1x256xbf16>
    %cst_12 = arith.constant dense<0.000000e+00> : vector<1x256xf32>
    %43 = tpu.matmul %42, %39, %cst_12 {dimension_numbers = #tpu.dot_dimension_numbers<[1], [0], [0], [1], [0, 0, 1, 1], [], []>} : vector<1x256xbf16>, vector<256x256xbf16>, vector<1x256xf32> -> vector<1x256xf32>
    %44 = arith.addf %12, %43 : vector<1x256xf32>
    %cst_13 = arith.constant dense<0.000000e+00> : vector<1xf32>
    %45 = vector.multi_reduction <add>, %21, %cst_13 [1] : vector<1x256xf32> to vector<1xf32>
    %46 = vector.shape_cast %45 : vector<1xf32> to vector<1x1xf32>
    %47 = arith.addf %13, %46 : vector<1x1xf32>
    %c1_i32 = arith.constant 1 : i32
    %48 = arith.addf %44, %7 : vector<1x256xf32>
    %cst_14 = arith.constant 1.000000e+00 : f32
    %49 = vector.broadcast %cst_14 : f32 to vector<1x256xf32>
    %50 = arith.addf %41, %49 : vector<1x256xf32>
    %51 = vector.broadcast %47 : vector<1x1xf32> to vector<1x256xf32>
    %52 = arith.subf %51, %48 : vector<1x256xf32>
    %53 = vector.broadcast %47 : vector<1x1xf32> to vector<1x256xf32>
    %54 = arith.addf %53, %50 : vector<1x256xf32>
    %55 = arith.subf %54, %48 : vector<1x256xf32>
    %56 = arith.divf %52, %55 : vector<1x256xf32>
    %cst_15 = arith.constant 1.000000e+00 : f32
    %57 = vector.broadcast %cst_15 : f32 to vector<1x256xf32>
    %58 = arith.subf %57, %56 : vector<1x256xf32>
    %59 = vector.broadcast %47 : vector<1x1xf32> to vector<1x256xf32>
    %60 = arith.subf %59, %44 : vector<1x256xf32>
    %61 = vector.broadcast %47 : vector<1x1xf32> to vector<1x256xf32>
    %62 = arith.addf %61, %41 : vector<1x256xf32>
    %63 = arith.subf %62, %44 : vector<1x256xf32>
    %64 = arith.divf %60, %63 : vector<1x256xf32>
    %cst_16 = arith.constant 1.000000e+00 : f32
    %65 = vector.broadcast %cst_16 : f32 to vector<1x256xf32>
    %66 = arith.subf %65, %64 : vector<1x256xf32>
    %cst_17 = arith.constant 1.000000e+00 : f32
    %67 = vector.broadcast %cst_17 : f32 to vector<1x256xf32>
    %68 = arith.cmpf oge, %41, %67 : vector<1x256xf32>
    %cst_18 = arith.constant 0.000000e+00 : f32
    %69 = vector.broadcast %cst_18 : f32 to vector<1x256xf32>
    %70 = arith.select %68, %66, %69 : vector<1x256xi1>, vector<1x256xf32>
    %71 = arith.subf %58, %70 : vector<1x256xf32>
    %cst_19 = arith.constant 0.000000e+00 : f32
    %72 = vector.broadcast %cst_19 : f32 to vector<1x256xf32>
    %73 = arith.maximumf %4, %72 : vector<1x256xf32>
    %74 = arith.mulf %73, %71 : vector<1x256xf32>
    %75 = vector.shape_cast %74 : vector<1x256xf32> to vector<1x1x256xf32>
    %cst_20 = arith.constant dense<0.000000e+00> : vector<1xf32>
    %76 = vector.multi_reduction <add>, %75, %cst_20 [1, 2] : vector<1x1x256xf32> to vector<1xf32>
    %77 = vector.shape_cast %76 : vector<1xf32> to vector<1x1x1xf32>
    %78 = vector.extract %77[0, 0, 0] : f32 from vector<1x1x1xf32>
    %79 = vector.broadcast %78 : f32 to vector<1x1x8x128xf32>
    %c0_21 = arith.constant 0 : index
    %c0_22 = arith.constant 0 : index
    %c0_23 = arith.constant 0 : index
    %c0_24 = arith.constant 0 : index
    %80 = vector.load %arg4[%c0_21, %c0_22, %c0_23, %c0_24] : memref<1x1x8x128xf32, #tpu.memory_space<vmem>>, vector<1x1x8x128xf32>
    tpu.vector_store %arg4[%c0_21, %c0_22, %c0_23, %c0_24], %79 {strides = array<i32>} : memref<1x1x8x128xf32, #tpu.memory_space<vmem>>, vector<1x1x8x128xf32>,
    return
  }
  func.func @transform_0(%arg0: i32, %arg1: i32) -> (i32, i32, i32) {
    %c0_i32 = arith.constant 0 : i32
    %c0_i32_0 = arith.constant 0 : i32
    %c0_i32_1 = arith.constant 0 : i32
    return %arg0, %c0_i32, %c0_i32_0 : i32, i32, i32
  }
  func.func @transform_1(%arg0: i32, %arg1: i32) -> (i32, i32, i32) {
    %c0_i32 = arith.constant 0 : i32
    %c0_i32_0 = arith.constant 0 : i32
    %c0_i32_1 = arith.constant 0 : i32
    return %arg0, %c0_i32, %c0_i32_0 : i32, i32, i32
  }
  func.func @transform_2(%arg0: i32, %arg1: i32) -> (i32, i32, i32, i32) {
    %c0_i32 = arith.constant 0 : i32
    %c0_i32_0 = arith.constant 0 : i32
    %c0_i32_1 = arith.constant 0 : i32
    return %arg0, %arg1, %c0_i32, %c0_i32_0 : i32, i32, i32, i32
  }
}

</mosaic_0001>

<bundles_post_ra>
// kernel: tpu_custom_call.1
= control target key start
LH: loop header
LB: loop body
LE: loop exit
PB: predicated region body
PF: predicated region fallthrough
CT: control target
= control target key end

     0   :  { %7 = vsyncpa [#allocation3], 0  ;;  %s2689_s0 = inlined_call_operand.hbm [shape: f32[2,1,256], index: 0, kind: input, shape index: {}]   ;;  %s2690_s1 = inlined_call_operand.hbm [shape: f32[2,1,256], index: 1, kind: input, shape index: {}]   ;;  %s2691_s2 = inlined_call_operand.hbm [shape: f32[2,1,8,128], index: 2, kind: output, shape index: {}]  }
   0x1   :  { %9 = vsyncpa [#allocation3 + $0x1], 0 }
   0x2   :  { %10 = vsyncpa [#allocation6], 0 }
   0x3   :  { %12 = vsyncpa [#allocation6 + $0x1], 0 }
   0x4   :  { %13 = vsyncpa [#allocation4], 0 }
   0x5   :  { %15 = vsyncpa [#allocation4 + $0x1], 0  ;;  %s1759_s9 = smov 0   ;;  %s1761_s10 = smov 0  }
   0x6   :  { %s1763_s11 = smov 0   ;;  %s1765_s12 = smov 0  }
   0x7   :  { %s1767_s13 = smov 0   ;;  %s1769_s14 = smov 0  }
   0x8 LB: > { %s1299_s15 = sadd.s32 4294967295, %s1735_s14   ;;  %s1300_s16 = sadd.s32 4294967294, %s1735_s14   ;;  %s1735_s14 = sphi %s1769_s14, %s21_s14   ;;  %s1731_s13 = sphi %s1767_s13, %s2871_s13   ;;  %s1727_s12 = sphi %s1765_s12, %s2870_s12   ;;  %s1723_s11 = sphi %s1763_s11, %s2869_s11   ;;  %s1719_s10 = sphi %s1761_s10, %s2868_s10   ;;  %s1715_s9 = sphi %s1759_s9, %s2867_s9  }
   0x9   : > { %s33_s17 = sadd.s32 1, %s1731_s13  ;;  %s40_s18 = sadd.s32 1, %s1723_s11 }
   0xa   : > { %p35_p0 = scmp.ge.s32.totalorder %s33_s17, 2  ;;  %p47_p1 = scmp.ne.s32.totalorder %s1723_s11, %s1719_s10 }
   0xb   : > { %p48_p2 = scmp.eq.s32.totalorder %s1735_s14, 0  ;;  %p53_p3 = scmp.ne.s32.totalorder %s1719_s10, %s1715_s9 }
   0xc   : > { %s2873_s17 = smov (%p35_p0, %s33_s17), 0  ;;  %p54_p5 = scmp.eq.s32.totalorder %s1299_s15, 0 }
   0xd   : > { %p1800_p4 = por %p48_p2, %p47_p1  ;;  %s37_s20 = ssub.s32 %s1731_s13, %s2873_s17 }
   0xe   : > { %p105_p6 = scmp.eq.s32.totalorder %s1299_s15, 1  ;;  %p38_p7 = scmp.eq.s32.totalorder %s37_s20, 0 }
   0xf   : > { %p1806_p8 = por %p54_p5, %p53_p3  ;;  %p111_p10 = scmp.eq.s32.totalorder %s1300_s16, 1 }
  0x10   : > { %p1810_p9 = por %p105_p6, %p47_p1  ;;  %p1530_p13 = scmp.lt.s32.totalorder %s1735_s14, 2 }
  0x11   : > { %s1815_s23 = scalar_select %p38_p7, %s1723_s11, %s40_s18  }
  0x12   : > { %p1817_p11 = por %p111_p10, %p53_p3  ;;  %s1824_s25 = sand.u32 1, %s1723_s11  }
  0x13   : > { %s1303_s26 = sshll.u32 %s1824_s25, 1  ;;  %s1509_s27 = sshll.u32 %s1731_s13, 5 }
  0x14   : > { %s141_s30 = scalar_lea.hbm %s2689_s0, %s1509_s27  ;;  %s135_s3 = scalar_lea.vmem [#allocation2], %s1303_s26 }
  0x15   : > { %s143_s4 = sshll.u32 %s135_s3, 4  ;;  %p1833_p0 = pnand %p1530_p13, %p1800_p4  ;;  %s144_s4 = int_to_ptr.vmem [resolvable:$true] %s143_s4 }
  0x16   : > { %p1309_p1 = scmp.ge.s32.totalorder %s1735_s14, 1  ;;  %p167_p2 = scmp.lt.s32.totalorder %s1735_s14, 3 }
  0x17   : > { %s132_s6 = scalar_lea.sflag [#allocation3], %s1824_s25  ;;  %p1597_p3 = pneg %p1833_p0 }
  0x18   : > { %s1608_s7 = scalar_lea.vmem %s144_s4, 32  ;;  %s1737_s8 = smov [#allocation2]  }
  0x19   : > { %p1609_p5 = scmp.ne.s32.totalorder %s144_s4, %s1608_s7  ;;  %s1613_s15 = sshll.u32 %s1737_s8, 4  ;;  %s1614_s15 = int_to_ptr.vmem [resolvable:$false] %s1613_s15 }
  0x1a   : > { %s1615_s16 = scalar_lea.vmem %s1614_s15, 64  ;;  %p1616_p4 = scmp.lt.s32.totalorder %s144_s4, %s1614_s15 }
  0x1b   : > { %p1611_p6 = pnand %p1609_p5, %p1597_p3  ;;  %p1617_p10 = scmp.lt.s32.totalorder %s1615_s16, %s1608_s7 }
  0x1d   : > { %p1612_p7 = pneg %p1611_p6  ;;  %p1618_p13 = por %p1617_p10, %p1616_p4 }
  0x1f   : > { %p1619_p12 = pnand %p1618_p13, %p1612_p7 }
  0x21   : > { %1622 = shalt.err (!%p1619_p12)
}
  0x22   : > { %1522 = dma.hbm_to_vmem [thread:$0]  (!%p1833_p0), %s141_s30, 32, %s144_s4, %s132_s6  }
  0x23   : > { %p1851_p5 = pnand %p1309_p1, %p167_p2  ;;  %s160_s28 = scalar_lea.hbm %s2690_s1, %s1509_s27 }
  0x24   : > { %s154_s29 = scalar_lea.vmem [#allocation5], %s1303_s26  ;;  %s151_s7 = scalar_lea.sflag [#allocation6], %s1824_s25 }
  0x25   : > { %s162_s3 = sshll.u32 %s154_s29, 4  ;;  %s1738_s30 = smov [#allocation5]   ;;  %s163_s3 = int_to_ptr.vmem [resolvable:$true] %s162_s3 }
  0x26   : > { %s1636_s8 = scalar_lea.vmem %s163_s3, 32  ;;  %s1641_s4 = sshll.u32 %s1738_s30, 4  ;;  %s1642_s4 = int_to_ptr.vmem [resolvable:$false] %s1641_s4 }
  0x27   : > { %p1637_p12 = scmp.ne.s32.totalorder %s163_s3, %s1636_s8  ;;  %s1643_s6 = scalar_lea.vmem %s1642_s4, 64 }
  0x28   : > { %p1644_p1 = scmp.lt.s32.totalorder %s163_s3, %s1642_s4  ;;  %p1645_p2 = scmp.lt.s32.totalorder %s1643_s6, %s1636_s8 }
  0x29   : > { %p1639_p6 = pnand %p1637_p12, %p1597_p3 }
  0x2a   : > { %p1646_p4 = por %p1645_p2, %p1644_p1 }
  0x2b   : > { %p1640_p7 = pneg %p1639_p6 }
  0x2d   : > { %p1647_p10 = pnand %p1646_p4, %p1640_p7 }
  0x2f   : > { %1650 = shalt.err (!%p1647_p10)
}
  0x30   : > { %1525 = dma.hbm_to_vmem [thread:$0]  (!%p1833_p0), %s160_s28, 32, %s163_s3, %s151_s7  }
  0x31   : > { %171 = sbr.rel (%p1851_p5) target bundleno = 946 (0x3b2), region = 28  ;;  %s1867_s25 = sand.u32 (!%p1851_p5), 1, %s1719_s10  }
  0x32   : > { %s1310_s26 = sshll.u32 (!%p1851_p5), %s1867_s25, 1  ;;  %s174_s27 = scalar_lea.sflag (!%p1851_p5), [#allocation3], %s1867_s25 }
  0x33   : > { %s1871_s15 = scalar_lea.vmem (!%p1851_p5), [#allocation2], %s1310_s26 }
  0x36   : > { %1702 = dma.done.wait (%p1806_p8), %s174_s27, 32  }
  0x37   : > { %1704 = vsyncadd (%p1806_p8), %s174_s27, 4294967264  ;;  %s183_s5 = scalar_lea.sflag [#allocation6], %s1867_s25  ;;  %s1878_s16 = scalar_lea.vmem [#allocation5], %s1310_s26 }
  0x38   : > { %1706 = dma.done.wait (%p1806_p8), %s183_s5, 32  }
  0x39   : > { %1708 = vsyncadd (%p1806_p8), %s183_s5, 4294967264  ;;  %v220_v0 = vlaneseq  ;;  %v1739_v1 = vmov 0   ;;  %v256_v4 = vld [vmem:[%s1871_s15] sm:$0x3]  ;;  %v2729_v47 = vmov 0  ;;  %v2731_v48 = vmov 0 }
  0x3a   : > { %1585 = vset.pattern.permute.xlu1 %v1739_v1  ;;  %v1913_v38 = vld [vmem:[%s1871_s15] sm:$0x3]  ;;  %v2733_v52 = vmov 0  ;;  %v2735_v53 = vmov 0  ;;  %v2737_v55 = vmov 0  ;;  %v2739_v56 = vmov 0 }
  0x3b   : > { %v1885_v2 = vshrl.u32 %v220_v0, 7  ;;  %v1924_v42 = vand.u32 127, %v220_v0  ;;  %v2741_v58 = vmov 0  ;;  %v2743_v60 = vmov 0  ;;  %s1312_s21 = sshll.u32 %s1867_s25, 3  ;;  %s1506_s20 = sshll.u32 %s1727_s12, 7 }
  0x3c   : > { %s211_s18 = scalar_lea.vmem [#allocation7], %s1312_s21  ;;  %s1193_s7 = scalar_lea.hbm %s2691_s2, %s1506_s20 }
  0x3d   : > { %v1888_v3 = vsub.s32 0, %v1885_v2  ;;  %v1893_v6 = vsub.s32 1, %v1885_v2  ;;  %v225_v45 = vadd.s32 8, %v1885_v2  ;;  %vm636_vm3 = vcmp.lt.s32.totalorder %v1885_v2, %v1924_v42  ;;  %s1195_s19 = sshll.u32 %s211_s18, 4  ;;  %s1181_s8 = scalar_lea.sflag [#allocation4], %s1867_s25  ;;  %s2644_s19 = int_to_ptr.vmem [resolvable:$true] %s1195_s19 }
  0x3e   : > { %v227_v50 = vadd.s32 24, %v1885_v2  ;;  %v226_v51 = vadd.s32 16, %v1885_v2  ;;  %s1651_s30 = scalar_lea.vmem %s2644_s19, 128  ;;  %s1743_s4 = smov [#allocation7]  }
  0x3f   : > { %v262_v5 = vrot.slane %v256_v4, %v1888_v3  ;;  %v266_v7 = vrot.slane %v256_v4, %v1893_v6  ;;  %v1917_v40 = vrot.slane %v1913_v38, %v1893_v6  ;;  %v1921_v41 = vrot.slane %v1913_v38, %v1888_v3  ;;  %p1652_p8 = scmp.ne.s32.totalorder %s2644_s19, %s1651_s30  ;;  %s1655_s12 = sshll.u32 %s1743_s4, 4  ;;  %s1656_s12 = int_to_ptr.vmem [resolvable:$false] %s1655_s12 }
  0x40   : > { %vm638_vm8 = vcmp.lt.s32.totalorder %v225_v45, %v1924_v42  ;;  %s1657_s6 = scalar_lea.vmem %s1656_s12, 256  ;;  %p1658_p13 = scmp.lt.s32.totalorder %s2644_s19, %s1656_s12 }
  0x41   : > { %269 = vxpose.xlu0.b32.start.end [1/1] (short) %v262_v5, 128  ;;  %v236_v5 = vadd.s32 96, %v1885_v2  ;;  %p1653_p0 = pnand %p1652_p8, %p1810_p9  ;;  %p1659_p5 = scmp.lt.s32.totalorder %s1657_s6, %s1651_s30 }
  0x43   : > { %p1654_p3 = pneg %p1653_p0  ;;  %p1660_p12 = por %p1659_p5, %p1658_p13 }
  0x45   : > { %p1661_p6 = pnand %p1660_p12, %p1654_p3 }
  0x7e   : > { %301 = vxpose.xlu0.b32.start.end [1/1] (short) %v266_v7, 128 }
  0xa7   : > { %1586 = vset.pattern.permute.xlu0 %v1739_v1 }
  0xbd   : > { %v285_v8 = vpop.trf.xlu0 }
  0xbe   : > { %335 = vperm.xlu1 %1585, %v285_v8   ;;  %v237_v8 = vadd.s32 104, %v1885_v2 }
  0xc1   : > { %v286_v9 = vpop.trf.xlu0 }
  0xc2   : > { %340 = vperm.xlu1 %1585, %v286_v9   ;;  %v234_v9 = vadd.s32 80, %v1885_v2 }
  0xc5   : > { %v287_v10 = vpop.trf.xlu0 }
  0xc6   : > { %345 = vperm.xlu1 %1585, %v287_v10  }
  0xc9   : > { %v288_v11 = vpop.trf.xlu0 }
  0xca   : > { %350 = vperm.xlu1 %1585, %v288_v11   ;;  %v238_v11 = vadd.s32 112, %v1885_v2 }
  0xcd   : > { %v289_v12 = vpop.trf.xlu0 }
  0xce   : > { %355 = vperm.xlu1 %1585, %v289_v12   ;;  %v2746_v12 = vmov 0 }
  0xd1   : > { %v290_v13 = vpop.trf.xlu0 }
  0xd2   : > { %360 = vperm.xlu1 %1585, %v290_v13   ;;  %v2062_v13 = vld [vmem:[%s1878_s16] sm:$0x3] }
  0xd5   : > { %v291_v14 = vpop.trf.xlu0 }
  0xd6   : > { %365 = vperm.xlu1 %1585, %v291_v14   ;;  %v247_v14 = vadd.s32 184, %v1885_v2 }
  0xd9   : > { %v292_v15 = vpop.trf.xlu0 }
  0xda   : > { %370 = vperm.xlu1 %1585, %v292_v15   ;;  %v1740_v15 = vmov 1065369472  }
  0xdb   : > { %1020 = vmatprep.mubr.bf16.mxu0 %v1740_v15 }
  0xdd   : > { %v293_v16 = vpop.trf.xlu0 }
  0xde   : > { %375 = vperm.xlu1 %1585, %v293_v16   ;;  %v2077_v16 = vrot.slane %v2062_v13, %v1893_v6 }
  0xe1   : > { %v294_v17 = vpop.trf.xlu0 }
  0xe2   : > { %380 = vperm.xlu1 %1585, %v294_v17  }
  0xe5   : > { %v295_v18 = vpop.trf.xlu0 }
  0xe6   : > { %385 = vperm.xlu1 %1585, %v295_v18   ;;  %v239_v18 = vadd.s32 120, %v1885_v2 }
  0xe9   : > { %v296_v19 = vpop.trf.xlu0 }
  0xea   : > { %390 = vperm.xlu1 %1585, %v296_v19   ;;  %v2751_v19 = vmov 0 }
  0xed   : > { %v297_v20 = vpop.trf.xlu0 }
  0xee   : > { %395 = vperm.xlu1 %1585, %v297_v20   ;;  %v2755_v20 = vmov 0 }
  0xf1   : > { %v298_v21 = vpop.trf.xlu0 }
  0xf2   : > { %400 = vperm.xlu1 %1585, %v298_v21   ;;  %v2758_v21 = vmov 0 }
  0xf5   : > { %v299_v22 = vpop.trf.xlu0 }
  0xf6   : > { %405 = vperm.xlu1 %1585, %v299_v22   ;;  %v2762_v22 = vmov 0 }
  0xf9   : > { %v300_v23 = vpop.trf.xlu0 }
  0xfa   : > { %410 = vperm.xlu1 %1585, %v300_v23   ;;  %v243_v23 = vadd.s32 152, %v1885_v2 }
  0xfd   : > { %v1896_v24 = vpop.trf.xlu0 }
 0x101   : > { %v1898_v25 = vpop.trf.xlu0 }
 0x105   : > { %v1900_v26 = vpop.trf.xlu0 }
 0x109   : > { %v1902_v27 = vpop.trf.xlu0 }
 0x10d   : > { %v1904_v28 = vpop.trf.xlu0 }
 0x111   : > { %v1906_v29 = vpop.trf.xlu0 }
 0x115   : > { %v1908_v30 = vpop.trf.xlu0 }
 0x119   : > { %v1910_v31 = vpop.trf.xlu0 }
 0x11d   : > { %v325_v32 = vpop.trf.xlu0 }
 0x121   : > { %v326_v33 = vpop.trf.xlu0 }
 0x125   : > { %v327_v34 = vpop.trf.xlu0 }
 0x129   : > { %v328_v35 = vpop.trf.xlu0 }
 0x12d   : > { %v329_v36 = vpop.trf.xlu0 }
 0x131   : > { %v330_v37 = vpop.trf.xlu0 }
 0x135   : > { %v331_v39 = vpop.trf.xlu0 }
 0x136   : > { %485 = vperm.xlu1 %1585, %v331_v39   ;;  %v233_v39 = vadd.s32 72, %v1885_v2 }
 0x139   : > { %v336_v43 = vpop.permute.xlu1 %335  ;;  %v332_v44 = vpop.trf.xlu0 }
 0x13a   : > { %475 = vperm.xlu1 %1585, %v329_v36   ;;  %490 = vperm.xlu0 %1586, %v332_v44   ;;  %vm505_vm0 = vcmp.gt.f32.partialorder %v336_v43, %v1917_v40  ;;  %vm569_vm1 = vcmp.eq.f32.partialorder %v336_v43, %v1917_v40  ;;  %vm568_vm2 = vcmp.eq.f32.partialorder %v336_v43, %v1921_v41  ;;  %v1741_v36 = vmov 1.0|1.0  }
 0x13b   : > { %vm1932_vm4 = vmor %vm505_vm0, %vm569_vm1  ;;  %vm504_vm13 = vcmp.gt.f32.partialorder %v336_v43, %v1921_v41  ;;  %v2801_v43 = vmov 0  ;;  %v2804_v44 = vmov 0 }
 0x13c   : > { %v2730_v47 = vsel %vm1932_vm4, 4294967295, %v2729_v47  ;;  %vm700_vm9 = vmand %vm568_vm2, %vm636_vm3 }
 0x13d   : > { %v341_v46 = vpop.permute.xlu1 %340  ;;  %vm1958_vm2 = vmor %vm504_vm13, %vm700_vm9 }
 0x13e   : > { %vm570_vm5 = vcmp.eq.f32.partialorder %v341_v46, %v1921_v41  ;;  %480 = vperm.xlu1 %1585, %v330_v37   ;;  %vm507_vm6 = vcmp.gt.f32.partialorder %v341_v46, %v1917_v40  ;;  %vm571_vm7 = vcmp.eq.f32.partialorder %v341_v46, %v1917_v40  ;;  %vm506_vm12 = vcmp.gt.f32.partialorder %v341_v46, %v1921_v41 }
 0x13f   : > { %vm1940_vm10 = vmor %vm507_vm6, %vm571_vm7  ;;  %v2736_v53 = vsel %vm1958_vm2, 4294967295, %v2735_v53  ;;  %v2797_v37 = vmov 0  ;;  %v228_v46 = vadd.s32 32, %v1885_v2 }
 0x140   : > { %v2732_v48 = vsel %vm1940_vm10, 4294967295, %v2731_v48  ;;  %vm702_vm14 = vmand %vm570_vm5, %vm638_vm8  ;;  %vm642_vm8 = vcmp.lt.s32.totalorder %v227_v50, %v1924_v42  ;;  %v2817_v50 = vmov 0 }
 0x141   : > { %v346_v49 = vpop.permute.xlu1 %345  ;;  %vm1954_vm1 = vmor %vm506_vm12, %vm702_vm14  ;;  %vm640_vm14 = vcmp.lt.s32.totalorder %v226_v51, %v1924_v42 }
 0x142   : > { %465 = vperm.xlu1 %1585, %v327_v34   ;;  %vm509_vm15 = vcmp.gt.f32.partialorder %v346_v49, %v1917_v40  ;;  %vm573_vm0 = vcmp.eq.f32.partialorder %v346_v49, %v1917_v40  ;;  %v2734_v52 = vsel %vm1954_vm1, 4294967295, %v2733_v52  ;;  %vm572_vm12 = vcmp.eq.f32.partialorder %v346_v49, %v1921_v41 }
 0x143   : > { %vm1962_vm3 = vmor %vm509_vm15, %vm573_vm0  ;;  %vm508_vm9 = vcmp.gt.f32.partialorder %v346_v49, %v1921_v41  ;;  %v2792_v34 = vmov 0  ;;  %v231_v49 = vadd.s32 56, %v1885_v2 }
 0x144   : > { %v2738_v55 = vsel %vm1962_vm3, 4294967295, %v2737_v55  ;;  %vm704_vm2 = vmand %vm572_vm12, %vm640_vm14 }
 0x145   : > { %v351_v54 = vpop.permute.xlu1 %350 }
 0x146   : > { %vm574_vm5 = vcmp.eq.f32.partialorder %v351_v54, %v1921_v41  ;;  %470 = vperm.xlu1 %1585, %v328_v35   ;;  %vm511_vm6 = vcmp.gt.f32.partialorder %v351_v54, %v1917_v40  ;;  %vm575_vm7 = vcmp.eq.f32.partialorder %v351_v54, %v1917_v40  ;;  %vm510_vm0 = vcmp.gt.f32.partialorder %v351_v54, %v1921_v41 }
 0x147   : > { %vm1975_vm13 = vmor %vm511_vm6, %vm575_vm7  ;;  %v230_v35 = vadd.s32 48, %v1885_v2  ;;  %v229_v54 = vadd.s32 40, %v1885_v2 }
 0x148   : > { %v2740_v56 = vsel %vm1975_vm13, 4294967295, %v2739_v56  ;;  %vm706_vm11 = vmand %vm574_vm5, %vm642_vm8 }
 0x149   : > { %v1985_v57 = vpop.permute.xlu1 %355  ;;  %vm1988_vm6 = vmor %vm510_vm0, %vm706_vm11 }
 0x14a   : > { %455 = vperm.xlu1 %1585, %v325_v32   ;;  %v2742_v58 = vsel %vm1988_vm6, 4294967295, %v2741_v58  ;;  %vm1994_vm7 = vmor %vm508_vm9, %vm704_vm2  ;;  %vm2764_vm6 = vcmp.lt.s32.totalorder %v237_v8, %v1924_v42  ;;  %v248_v8 = vadd.s32 192, %v1885_v2 }
 0x14b   : > { %v2744_v60 = vsel %vm1994_vm7, 4294967295, %v2743_v60 }
 0x14d   : > { %v1992_v59 = vpop.permute.xlu1 %360 }
 0x14e   : > { %460 = vperm.xlu1 %1585, %v326_v33   ;;  %v2788_v33 = vmov 0 }
 0x151   : > { %v2002_v61 = vpop.permute.xlu1 %365 }
 0x152   : > { %445 = vperm.xlu1 %1585, %v1908_v30   ;;  %v235_v30 = vadd.s32 88, %v1885_v2 }
 0x155   : > { %v2005_v62 = vpop.permute.xlu1 %370 }
 0x156   : > { %450 = vperm.xlu1 %1585, %v1910_v31   ;;  %v2781_v31 = vmov 0 }
 0x159   : > { %v2008_v63 = vpop.permute.xlu1 %375 }
 0x15a   : > { %435 = vperm.xlu1 %1585, %v1904_v28  }
 0x15d   : > { %v2011_v0 = vpop.permute.xlu1 %380 }
 0x15e   : > { %440 = vperm.xlu1 %1585, %v1906_v29   ;;  %vm2753_vm0 = vcmp.eq.f32.partialorder %v2011_v0, %v1917_v40 }
 0x161   : > { %v2014_v1 = vpop.permute.xlu1 %385 }
 0x162   : > { %425 = vperm.xlu1 %1585, %v1900_v26   ;;  %vm589_vm8 = vcmp.eq.f32.partialorder %v2014_v1, %v1917_v40  ;;  %vm2745_vm1 = vcmp.gt.f32.partialorder %v2014_v1, %v1917_v40  ;;  %v1041_v26 = vpack.c.bf16 %v2077_v16, %v2077_v16 }
 0x163   : > { %vm2055_vm4 = vmor %vm2745_vm1, %vm589_vm8  ;;  %vm2754_vm1 = vcmp.gt.f32.partialorder %v2011_v0, %v1917_v40  ;;  %vm2760_vm8 = vcmp.lt.s32.totalorder %v236_v5, %v1924_v42  ;;  %v251_v5 = vadd.s32 216, %v1885_v2 }
 0x164   : > { %v2747_v12 = vsel %vm2055_vm4, 4294967295, %v2746_v12  ;;  %vm2097_vm11 = vmor %vm2754_vm1, %vm2753_vm0  ;;  %vm2768_vm1 = vcmp.eq.f32.partialorder %v2008_v63, %v1917_v40  ;;  %vm2769_vm0 = vcmp.gt.f32.partialorder %v2008_v63, %v1917_v40  ;;  %1074 = vmatprep.mubr.bf16.mxu1 %v1041_v26 }
 0x165   : > { %v2017_v4 = vpop.permute.xlu1 %390  ;;  %v2756_v20 = vsel %vm2097_vm11, 4294967295, %v2755_v20  ;;  %vm2143_vm3 = vmor %vm2769_vm0, %vm2768_vm1  ;;  %vm2779_vm0 = vcmp.eq.f32.partialorder %v2005_v62, %v1917_v40  ;;  %vm2787_vm11 = vcmp.eq.f32.partialorder %v2014_v1, %v1921_v41 }
 0x166   : > { %430 = vperm.xlu1 %1585, %v1902_v27   ;;  %vm527_vm12 = vcmp.gt.f32.partialorder %v2017_v4, %v1917_v40  ;;  %vm591_vm14 = vcmp.eq.f32.partialorder %v2017_v4, %v1917_v40  ;;  %v241_v27 = vadd.s32 136, %v1885_v2 }
 0x167   : > { %vm2068_vm9 = vmor %vm527_vm12, %vm591_vm14 }
 0x169   : > { %v2021_v7 = vpop.permute.xlu1 %395 }
 0x16a   : > { %415 = vperm.xlu1 %1585, %v1896_v24   ;;  %vm593_vm2 = vcmp.eq.f32.partialorder %v2021_v7, %v1917_v40  ;;  %vm2757_vm10 = vcmp.gt.f32.partialorder %v2021_v7, %v1917_v40  ;;  %vm2761_vm15 = vcmp.eq.f32.partialorder %v2021_v7, %v1921_v41  ;;  %v2770_v24 = vmov 0 }
 0x16b   : > { %vm2112_vm7 = vmor %vm2757_vm10, %vm593_vm2  ;;  %v2771_v24 = vsel %vm2143_vm3, 4294967295, %v2770_v24 }
 0x16c   : > { %v2759_v21 = vsel %vm2112_vm7, 4294967295, %v2758_v21 }
 0x16d   : > { %v2031_v10 = vpop.permute.xlu1 %400 }
 0x16e   : > { %420 = vperm.xlu1 %1585, %v1898_v25   ;;  %vm595_vm5 = vcmp.eq.f32.partialorder %v2031_v10, %v1917_v40  ;;  %vm2750_vm12 = vcmp.gt.f32.partialorder %v2031_v10, %v1917_v40  ;;  %vm2765_vm10 = vcmp.eq.f32.partialorder %v2031_v10, %v1921_v41  ;;  %v232_v25 = vadd.s32 64, %v1885_v2 }
 0x16f   : > { %vm2087_vm14 = vmor %vm2750_vm12, %vm595_vm5 }
 0x170   : > { %v2752_v19 = vsel %vm2087_vm14, 4294967295, %v2751_v19  ;;  %vm2124_vm5 = vmand %vm2761_vm15, %vm2760_vm8 }
 0x171   : > { %v406_v17 = vpop.permute.xlu1 %405  ;;  %v2763_v22 = vsel %vm2124_vm5, 4294967295, %v2762_v22  ;;  %vm2133_vm2 = vmand %vm2765_vm10, %vm2764_vm6  ;;  %vm2772_vm6 = vcmp.lt.s32.totalorder %v238_v11, %v1924_v42  ;;  %vm2780_vm10 = vcmp.gt.f32.partialorder %v2005_v62, %v1917_v40 }
 0x172   : > { %vm596_vm12 = vcmp.eq.f32.partialorder %v406_v17, %v1921_v41  ;;  %vm2775_vm15 = vcmp.eq.f32.partialorder %v406_v17, %v1917_v40  ;;  %vm2183_vm13 = vmor %vm2780_vm10, %vm2779_vm0  ;;  %vm2783_vm7 = vcmp.gt.f32.partialorder %v406_v17, %v1921_v41  ;;  %vm579_vm0 = vcmp.eq.f32.partialorder %v1992_v59, %v1917_v40 }
 0x173   : > { %vm2154_vm8 = vmand %vm596_vm12, %vm2772_vm6  ;;  %vm2776_vm12 = vcmp.gt.f32.partialorder %v406_v17, %v1917_v40  ;;  %v2782_v31 = vsel %vm2183_vm13, 4294967295, %v2781_v31  ;;  %vm2786_vm13 = vcmp.lt.s32.totalorder %v234_v9, %v1924_v42  ;;  %v244_v17 = vadd.s32 160, %v1885_v2 }
 0x174   : > { %vm2171_vm6 = vmor %vm2776_vm12, %vm2775_vm15 }
 0x175   : > { %v411_v28 = vpop.permute.xlu1 %410  ;;  %vm2196_vm14 = vmor %vm2783_vm7, %vm2154_vm8  ;;  %vm2790_vm7 = vcmp.eq.f32.partialorder %v2002_v61, %v1917_v40  ;;  %vm2791_vm8 = vcmp.gt.f32.partialorder %v2002_v61, %v1917_v40 }
 0x176   : > { %vm535_vm12 = vcmp.gt.f32.partialorder %v411_v28, %v1917_v40  ;;  %vm599_vm5 = vcmp.eq.f32.partialorder %v411_v28, %v1917_v40  ;;  %vm534_vm15 = vcmp.gt.f32.partialorder %v411_v28, %v1921_v41  ;;  %vm2208_vm1 = vmand %vm2787_vm11, %vm2786_vm13  ;;  %vm530_vm11 = vcmp.gt.f32.partialorder %v2031_v10, %v1921_v41 }
 0x177   : > { %vm795_vm10 = vmor %vm535_vm12, %vm599_vm5  ;;  %v2789_v33 = vsel %vm2208_vm1, 4294967295, %v2788_v33  ;;  %v249_v10 = vadd.s32 200, %v1885_v2 }
 0x178   : > { %vm2218_vm3 = vmor %vm2791_vm8, %vm2790_vm7  ;;  %vm577_vm8 = vcmp.eq.f32.partialorder %v1985_v57, %v1917_v40  ;;  %vm2796_vm7 = vcmp.gt.f32.partialorder %v1992_v59, %v1917_v40 }
 0x179   : > { %v2793_v34 = vsel %vm2218_vm3, 4294967295, %v2792_v34  ;;  %vm1377_vm13 = vmpackc.low %vm795_vm10, %vm2171_vm6  ;;  %vm2794_vm6 = vcmp.lt.s32.totalorder %v239_v18, %v1924_v42  ;;  %vm2795_vm10 = vcmp.eq.f32.partialorder %v411_v28, %v1921_v41  ;;  %vm650_vm3 = vcmp.lt.s32.totalorder %v231_v49, %v1924_v42 }
 0x17a   : > { %1378 = vmatprep.subr.msk.bf16.mxu0 %vm1377_vm13, %v1741_v36  ;;  %1442 = vmatprep.subr.msk.bf16.mxu1 %vm1377_vm13, %v1741_v36  ;;  %vm730_vm5 = vmand %vm2795_vm10, %vm2794_vm6  ;;  %vm590_vm13 = vcmp.eq.f32.partialorder %v2017_v4, %v1921_v41  ;;  %vm658_vm6 = vcmp.lt.s32.totalorder %v235_v30, %v1924_v42 }
 0x17b   : > { %vm2250_vm12 = vmor %vm2796_vm7, %vm579_vm0  ;;  %vm2799_vm0 = vcmp.lt.s32.totalorder %v232_v25, %v1924_v42  ;;  %vm2800_vm7 = vcmp.eq.f32.partialorder %v2008_v63, %v1921_v41  ;;  %v240_v25 = vadd.s32 128, %v1885_v2 }
 0x17c   : > { %v2798_v37 = vsel %vm2250_vm12, 4294967295, %v2797_v37  ;;  %vm794_vm1 = vmor %vm534_vm15, %vm730_vm5  ;;  %vm2803_vm15 = vcmp.gt.f32.partialorder %v1985_v57, %v1917_v40 }
 0x17d   : > { %vm1379_vm10 = vmpackc.low %vm794_vm1, %vm2196_vm14  ;;  %vm2810_vm14 = vnez %v2752_v19  ;;  %v245_v19 = vadd.s32 168, %v1885_v2 }
 0x17e   : > { %vm2269_vm12 = vmand %vm2800_vm7, %vm2799_vm0  ;;  %1380 = vmatpush1.bf16.msk.msra.mxu0 %vm1379_vm10, %v1741_v36  ;;  %1444 = vmatpush1.bf16.msk.msra.mxu1 %vm1379_vm10, %v1741_v36  ;;  %vm2811_vm10 = vnez %v2759_v21  ;;  %vm2815_vm0 = vcmp.gt.f32.partialorder %v2021_v7, %v1921_v41  ;;  %v242_v21 = vadd.s32 144, %v1885_v2 }
 0x17f   : > { %v2802_v43 = vsel %vm2269_vm12, 4294967295, %v2801_v43  ;;  %vm2276_vm5 = vmor %vm2803_vm15, %vm577_vm8  ;;  %vm648_vm15 = vcmp.lt.s32.totalorder %v230_v35, %v1924_v42  ;;  %vm586_vm12 = vcmp.eq.f32.partialorder %v2011_v0, %v1921_v41 }
 0x180   : > { %v2805_v44 = vsel %vm2276_vm5, 4294967295, %v2804_v44  ;;  %vm2286_vm1 = vmor %vm530_vm11, %vm2133_vm2  ;;  %vm526_vm11 = vcmp.gt.f32.partialorder %v2017_v4, %v1921_v41  ;;  %vm516_vm5 = vcmp.gt.f32.partialorder %v2002_v61, %v1921_v41 }
 0x181   : > { %vm2812_vm4 = vmpackc.low %vm2810_vm14, %vm2811_vm10  ;;  %vm654_vm14 = vcmp.lt.s32.totalorder %v233_v39, %v1924_v42 }
 0x182   : > { %1382 = vmatprep.subr.msk.bf16.mxu0 %vm2812_vm4, %v1741_v36  ;;  %vm2813_vm2 = vmmov %vm2812_vm4  ;;  %vm2814_vm4 = vnez %v2763_v22 }
 0x183   : > { %1446 = vmatprep.subr.msk.bf16.mxu1 %vm2813_vm2, %v1741_v36  ;;  %vm722_vm7 = vmand %vm590_vm13, %vm658_vm6  ;;  %vm524_vm2 = vcmp.gt.f32.partialorder %v2014_v1, %v1921_v41  ;;  %vm2816_vm13 = vcmp.eq.f32.partialorder %v2002_v61, %v1921_v41  ;;  %v2427_v61 = vrot.slane %v2062_v13, %v1888_v3  ;;  %v250_v1 = vadd.s32 208, %v1885_v2 }
 0x184   : > { %vm788_vm8 = vmor %vm2815_vm0, %vm2814_vm4 }
 0x185   : > { %vm1383_vm10 = vmpackc.low %vm2286_vm1, %vm788_vm8  ;;  %vm582_vm8 = vcmp.eq.f32.partialorder %v2005_v62, %v1921_v41  ;;  %v1040_v30 = vpack.c.bf16 %v2427_v61, %v2427_v61 }
 0x186   : > { %vm2331_vm6 = vmand %vm2816_vm13, %vm648_vm15  ;;  %1384 = vmatpush1.bf16.msk.msra.mxu0 %vm1383_vm10, %v1741_v36  ;;  %1448 = vmatpush1.bf16.msk.msra.mxu1 %vm1383_vm10, %v1741_v36  ;;  %vm644_vm15 = vcmp.lt.s32.totalorder %v228_v46, %v1924_v42  ;;  %vm2822_vm13 = vnez %v2747_v12  ;;  %v246_v12 = vadd.s32 176, %v1885_v2 }
 0x187   : > { %v2818_v50 = vsel %vm2331_vm6, 4294967295, %v2817_v50  ;;  %vm2339_vm4 = vmor %vm526_vm11, %vm722_vm7  ;;  %vm522_vm11 = vcmp.gt.f32.partialorder %v2011_v0, %v1921_v41  ;;  %vm2825_vm6 = vnez %v2789_v33  ;;  %v2827_v0 = vmov 0 }
 0x188   : > { %vm2823_vm0 = vmpackc.low %vm2068_vm9, %vm2822_vm13  ;;  %vm520_vm13 = vcmp.gt.f32.partialorder %v2008_v63, %v1921_v41 }
 0x189   : > { %1386 = vmatprep.subr.msk.bf16.mxu0 %vm2823_vm0, %v1741_v36  ;;  %vm2824_vm7 = vmmov %vm2823_vm0 }
 0x18a   : > { %1450 = vmatprep.subr.msk.bf16.mxu1 %vm2824_vm7, %v1741_v36  ;;  %vm718_vm10 = vmand %vm586_vm12, %vm654_vm14  ;;  %vm2826_vm7 = vcmp.eq.f32.partialorder %v1985_v57, %v1921_v41 }
 0x18b   : > { %vm784_vm0 = vmor %vm524_vm2, %vm2825_vm6  ;;  %vm2829_vm2 = vnez %v2798_v37 }
 0x18c   : > { %vm1387_vm9 = vmpackc.low %vm2339_vm4, %vm784_vm0  ;;  %vm2830_vm4 = vnez %v2756_v20  ;;  %vm2831_vm0 = vnez %v2771_v24 }
 0x18d   : > { %vm2378_vm12 = vmand %vm2826_vm7, %vm644_vm15  ;;  %1388 = vmatpush1.bf16.msk.msra.mxu0 %vm1387_vm9, %v1741_v36  ;;  %1452 = vmatpush1.bf16.msk.msra.mxu1 %vm1387_vm9, %v1741_v36  ;;  %vm578_vm9 = vcmp.eq.f32.partialorder %v1992_v59, %v1921_v41  ;;  %vm2834_vm7 = vnez %v2802_v43 }
 0x18e   : > { %v2828_v0 = vsel %vm2378_vm12, 4294967295, %v2827_v0  ;;  %vm782_vm14 = vmor %vm522_vm11, %vm718_vm10  ;;  %vm518_vm11 = vcmp.gt.f32.partialorder %v2005_v62, %v1921_v41  ;;  %vm646_vm12 = vcmp.lt.s32.totalorder %v229_v54, %v1924_v42 }
 0x18f   : > { %vm2832_vm1 = vmpackc.low %vm2830_vm4, %vm2831_vm0  ;;  %vm2722_vm0 = vcmask 1040384  }
 0x190   : > { %1390 = vmatprep.subr.msk.bf16.mxu0 %vm2832_vm1, %v1741_v36  ;;  %vm2833_vm15 = vmmov %vm2832_vm1  ;;  %v1084_v62 = vsel %vm2722_vm0, %v2427_v61, 0.0  ;;  %v1085_v63 = vsel %vm2722_vm0, %v2077_v16, 0.0 }
 0x191   : > { %1454 = vmatprep.subr.msk.bf16.mxu1 %vm2833_vm15, %v1741_v36  ;;  %vm714_vm10 = vmand %vm582_vm8, %vm650_vm3  ;;  %vm2835_vm3 = vnez %v2782_v31  ;;  %vm2836_vm8 = vnez %v2793_v34 }
 0x192   : > { %vm780_vm6 = vmor %vm520_vm13, %vm2834_vm7 }
 0x193   : > { %vm1391_vm1 = vmpackc.low %vm782_vm14, %vm780_vm6  ;;  %vm514_vm14 = vcmp.gt.f32.partialorder %v1992_v59, %v1921_v41 }
 0x194   : > { %1392 = vmatpush1.bf16.msk.msra.mxu0 %vm1391_vm1, %v1741_v36  ;;  %1456 = vmatpush1.bf16.msk.msra.mxu1 %vm1391_vm1, %v1741_v36  ;;  %vm778_vm4 = vmor %vm518_vm11, %vm714_vm10  ;;  %vm2839_vm11 = vnez %v2818_v50  ;;  %vm512_vm1 = vcmp.gt.f32.partialorder %v1985_v57, %v1921_v41  ;;  %v1086_v57 = vadd.f32 %v1085_v63, %v1084_v62 }
 0x195   : > { %vm2837_vm15 = vmpackc.low %vm2835_vm3, %vm2836_vm8  ;;  %vm2843_vm3 = vnez %v2828_v0 }
 0x196   : > { %1394 = vmatprep.subr.msk.bf16.mxu0 %vm2837_vm15, %v1741_v36  ;;  %vm2838_vm13 = vmmov %vm2837_vm15  ;;  %1087 = vadd.xlane.f32.xlu1 %v1086_v57 }
 0x197   : > { %1458 = vmatprep.subr.msk.bf16.mxu1 %vm2838_vm13, %v1741_v36  ;;  %vm710_vm6 = vmand %vm578_vm9, %vm646_vm12  ;;  %vm2844_vm13 = vnez %v2740_v56 }
 0x198   : > { %vm776_vm10 = vmor %vm516_vm5, %vm2839_vm11  ;;  %vm2840_vm5 = vnez %v2805_v44  ;;  %vm2848_vm11 = vnez %v2742_v58  ;;  %v255_v58 = vadd.s32 248, %v1885_v2 }
 0x199   : > { %vm1395_vm7 = vmpackc.low %vm778_vm4, %vm776_vm10  ;;  %vm2849_vm10 = vnez %v2744_v60 }
 0x19a   : > { %1396 = vmatpush1.bf16.msk.msra.mxu0 %vm1395_vm7, %v1741_v36  ;;  %1460 = vmatpush1.bf16.msk.msra.mxu1 %vm1395_vm7, %v1741_v36  ;;  %vm774_vm12 = vmor %vm514_vm14, %vm710_vm6  ;;  %vm2845_vm14 = vnez %v2738_v55  ;;  %v252_v55 = vadd.s32 224, %v1885_v2 }
 0x19b   : > { %vm2841_vm9 = vmpackc.low %vm2829_vm2, %vm2840_vm5  ;;  %vm2853_vm5 = vnez %v2730_v47  ;;  %v254_v47 = vadd.s32 240, %v1885_v2 }
 0x19c   : > { %1398 = vmatprep.subr.msk.bf16.mxu0 %vm2841_vm9, %v1741_v36  ;;  %vm2842_vm4 = vmmov %vm2841_vm9 }
 0x19d   : > { %1462 = vmatprep.subr.msk.bf16.mxu1 %vm2842_vm4, %v1741_v36  ;;  %vm772_vm8 = vmor %vm512_vm1, %vm2843_vm3  ;;  %vm2856_vm3 = vnez %v2734_v52  ;;  %v253_v52 = vadd.s32 232, %v1885_v2 }
 0x19e   : > { %vm1399_vm15 = vmpackc.low %vm774_vm12, %vm772_vm8  ;;  %vm2852_vm12 = vnez %v2732_v48  ;;  %vm2857_vm8 = vnez %v2736_v53  ;;  %v2504_v48 = vadd.s32 128, %v1924_v42 }
 0x19f   : > { %1400 = vmatpush1.bf16.msk.msra.mxu0 %vm1399_vm15, %v1741_v36  ;;  %1464 = vmatpush1.bf16.msk.msra.mxu1 %vm1399_vm15, %v1741_v36  ;;  %vm2846_vm6 = vmpackc.low %vm2844_vm13, %vm2845_vm14 }
 0x1a0   : > { %1402 = vmatprep.subr.msk.bf16.mxu0 %vm2846_vm6, %v1741_v36  ;;  %vm2847_vm2 = vmmov %vm2846_vm6  ;;  %vm697_vm14 = vcmp.lt.s32.totalorder %v254_v47, %v2504_v48 }
 0x1a1   : > { %1466 = vmatprep.subr.msk.bf16.mxu1 %vm2847_vm2, %v1741_v36  ;;  %vm2850_vm7 = vmpackc.low %vm2848_vm11, %vm2849_vm10  ;;  %vm693_vm10 = vcmp.lt.s32.totalorder %v252_v55, %v2504_v48 }
 0x1a2   : > { %vm2851_vm1 = vmmov %vm2850_vm7 }
 0x1a3   : > { %1404 = vmatpush1.bf16.msk.msra.mxu0 %vm2850_vm7, %v1741_v36  ;;  %1468 = vmatpush1.bf16.msk.msra.mxu1 %vm2851_vm1, %v1741_v36  ;;  %vm2854_vm9 = vmpackc.low %vm2852_vm12, %vm2853_vm5  ;;  %vm699_vm7 = vcmp.lt.s32.totalorder %v255_v58, %v2504_v48  ;;  %v1742_v58 = vmov 1966171168  }
 0x1a4   : > { %1406 = vmatprep.subr.msk.bf16.mxu0 %vm2854_vm9, %v1741_v36  ;;  %vm2855_vm4 = vmmov %vm2854_vm9 }
 0x1a5   : > { %1470 = vmatprep.subr.msk.bf16.mxu1 %vm2855_vm4, %v1741_v36  ;;  %vm2858_vm15 = vmpackc.low %vm2856_vm3, %vm2857_vm8 }
 0x1a6   : > { %vm2859_vm13 = vmmov %vm2858_vm15 }
 0x1a7   : > { %1408 = vmatpush1.bf16.msk.msra.mxu0 %vm2858_vm15, %v1741_v36  ;;  %1472 = vmatpush1.bf16.msk.msra.mxu1 %vm2859_vm13, %v1741_v36  ;;  %vm695_vm15 = vcmp.lt.s32.totalorder %v253_v52, %v2504_v48  ;;  %v1140_v52 = vunpack.c.l.s4 %v1742_v58 }
 0x1b1   : > { %v486_v56 = vpop.permute.xlu1 %485 }
 0x1b2   : > { %vm629_vm6 = vcmp.eq.f32.partialorder %v486_v56, %v1917_v40  ;;  %vm565_vm2 = vcmp.gt.f32.partialorder %v486_v56, %v1917_v40  ;;  %vm564_vm13 = vcmp.gt.f32.partialorder %v486_v56, %v1921_v41 }
 0x1b3   : > { %vm761_vm11 = vmand %vm629_vm6, %vm697_vm14 }
 0x1b4   : > { %vm2516_vm12 = vmor %vm565_vm2, %vm761_vm11 }
 0x1b5   : > { %v476_v42 = vpop.permute.xlu1 %475  ;;  %v491_v53 = vpop.permute.xlu0 %490 }
 0x1b6   : > { %vm625_vm1 = vcmp.eq.f32.partialorder %v476_v42, %v1917_v40  ;;  %vm566_vm9 = vcmp.gt.f32.partialorder %v491_v53, %v1921_v41  ;;  %vm567_vm4 = vcmp.gt.f32.partialorder %v491_v53, %v1917_v40  ;;  %vm631_vm3 = vcmp.eq.f32.partialorder %v491_v53, %v1917_v40 }
 0x1b7   : > { %vm2520_vm5 = vmand %vm625_vm1, %vm693_vm10  ;;  %vm561_vm6 = vcmp.gt.f32.partialorder %v476_v42, %v1917_v40 }
 0x1b8   : > { %vm763_vm8 = vmand %vm631_vm3, %vm699_vm7  ;;  %vm689_vm7 = vcmp.lt.s32.totalorder %v250_v1, %v2504_v48 }
 0x1b9   : > { %vm827_vm14 = vmor %vm567_vm4, %vm763_vm8  ;;  %v481_v4 = vpop.permute.xlu1 %480 }
 0x1ba   : > { %vm1411_vm2 = vmpackc.low %vm566_vm9, %vm564_vm13  ;;  %vm627_vm11 = vcmp.eq.f32.partialorder %v481_v4, %v1917_v40  ;;  %vm563_vm10 = vcmp.gt.f32.partialorder %v481_v4, %v1917_v40  ;;  %vm562_vm4 = vcmp.gt.f32.partialorder %v481_v4, %v1921_v41  ;;  %vm560_vm13 = vcmp.gt.f32.partialorder %v476_v42, %v1921_v41 }
 0x1bb   : > { %vm759_vm1 = vmand %vm627_vm11, %vm695_vm15 }
 0x1bc   : > { %vm1409_vm0 = vmpackc.low %vm827_vm14, %vm2516_vm12 }
 0x1bd   : > { %1410 = vmatprep.subr.msk.bf16.mxu0 %vm1409_vm0, %v1741_v36  ;;  %1474 = vmatprep.subr.msk.bf16.mxu1 %vm1409_vm0, %v1741_v36  ;;  %v466_v7 = vpop.permute.xlu1 %465  ;;  %vm821_vm9 = vmor %vm561_vm6, %vm2520_vm5  ;;  %vm691_vm0 = vcmp.lt.s32.totalorder %v251_v5, %v2504_v48 }
 0x1be   : > { %1412 = vmatpush2.bf16.msk.msra.mxu0 %vm1411_vm2, %v1741_v36  ;;  %1476 = vmatpush2.bf16.msk.msra.mxu1 %vm1411_vm2, %v1741_v36  ;;  %vm621_vm12 = vcmp.eq.f32.partialorder %v466_v7, %v1917_v40  ;;  %vm823_vm3 = vmor %vm563_vm10, %vm759_vm1  ;;  %vm557_vm8 = vcmp.gt.f32.partialorder %v466_v7, %v1917_v40 }
 0x1bf   : > { %vm753_vm15 = vmand %vm621_vm12, %vm689_vm7  ;;  %vm685_vm7 = vcmp.lt.s32.totalorder %v248_v8, %v2504_v48 }
 0x1c0   : > { %vm1413_vm14 = vmpackc.low %vm823_vm3, %vm821_vm9 }
 0x1c1   : > { %1414 = vmatprep.subr.msk.bf16.mxu0 %vm1413_vm14, %v1741_v36  ;;  %1478 = vmatprep.subr.msk.bf16.mxu1 %vm1413_vm14, %v1741_v36  ;;  %vm1415_vm5 = vmpackc.low %vm562_vm4, %vm560_vm13  ;;  %v471_v9 = vpop.permute.xlu1 %470  ;;  %vm556_vm4 = vcmp.gt.f32.partialorder %v466_v7, %v1921_v41  ;;  %vm687_vm14 = vcmp.lt.s32.totalorder %v249_v10, %v2504_v48  ;;  %v1141_v10 = vunpack.c.0.s8 %v1140_v52 }
 0x1c2   : > { %1416 = vmatpush2.bf16.msk.msra.mxu0 %vm1415_vm5, %v1741_v36  ;;  %1480 = vmatpush2.bf16.msk.msra.mxu1 %vm1415_vm5, %v1741_v36  ;;  %vm559_vm6 = vcmp.gt.f32.partialorder %v471_v9, %v1917_v40  ;;  %vm623_vm2 = vcmp.eq.f32.partialorder %v471_v9, %v1917_v40  ;;  %vm817_vm11 = vmor %vm557_vm8, %vm753_vm15  ;;  %vm558_vm10 = vcmp.gt.f32.partialorder %v471_v9, %v1921_v41 }
 0x1c3   : > { %vm755_vm1 = vmand %vm623_vm2, %vm691_vm0 }
 0x1c4   : > { %vm819_vm9 = vmor %vm559_vm6, %vm755_vm1 }
 0x1c5   : > { %v456_v11 = vpop.permute.xlu1 %455  ;;  %vm1417_vm12 = vmpackc.low %vm819_vm9, %vm817_vm11 }
 0x1c6   : > { %vm617_vm3 = vcmp.eq.f32.partialorder %v456_v11, %v1917_v40  ;;  %1418 = vmatprep.subr.msk.bf16.mxu0 %vm1417_vm12, %v1741_v36  ;;  %1482 = vmatprep.subr.msk.bf16.mxu1 %vm1417_vm12, %v1741_v36  ;;  %vm1419_vm13 = vmpackc.low %vm558_vm10, %vm556_vm4  ;;  %vm553_vm8 = vcmp.gt.f32.partialorder %v456_v11, %v1917_v40  ;;  %vm681_vm10 = vcmp.lt.s32.totalorder %v246_v12, %v2504_v48 }
 0x1c7   : > { %vm749_vm15 = vmand %vm617_vm3, %vm685_vm7  ;;  %1420 = vmatpush2.bf16.msk.msra.mxu0 %vm1419_vm13, %v1741_v36  ;;  %1484 = vmatpush2.bf16.msk.msra.mxu1 %vm1419_vm13, %v1741_v36  ;;  %vm552_vm7 = vcmp.gt.f32.partialorder %v456_v11, %v1921_v41 }
 0x1c8   : > { %vm813_vm6 = vmor %vm553_vm8, %vm749_vm15  ;;  %vm683_vm8 = vcmp.lt.s32.totalorder %v247_v14, %v2504_v48 }
 0x1c9   : > { %v461_v13 = vpop.permute.xlu1 %460 }
 0x1ca   : > { %vm555_vm0 = vcmp.gt.f32.partialorder %v461_v13, %v1917_v40  ;;  %vm619_vm5 = vcmp.eq.f32.partialorder %v461_v13, %v1917_v40  ;;  %vm554_vm2 = vcmp.gt.f32.partialorder %v461_v13, %v1921_v41 }
 0x1cb   : > { %vm751_vm11 = vmand %vm619_vm5, %vm687_vm14 }
 0x1cc   : > { %vm815_vm1 = vmor %vm555_vm0, %vm751_vm11 }
 0x1cd   : > { %v446_v16 = vpop.permute.xlu1 %445  ;;  %vm1421_vm9 = vmpackc.low %vm815_vm1, %vm813_vm6 }
 0x1ce   : > { %vm613_vm4 = vcmp.eq.f32.partialorder %v446_v16, %v1917_v40  ;;  %1422 = vmatprep.subr.msk.bf16.mxu0 %vm1421_vm9, %v1741_v36  ;;  %1486 = vmatprep.subr.msk.bf16.mxu1 %vm1421_vm9, %v1741_v36  ;;  %vm1423_vm12 = vmpackc.low %vm554_vm2, %vm552_vm7  ;;  %vm549_vm3 = vcmp.gt.f32.partialorder %v446_v16, %v1917_v40  ;;  %vm677_vm2 = vcmp.lt.s32.totalorder %v244_v17, %v2504_v48 }
 0x1cf   : > { %vm745_vm13 = vmand %vm613_vm4, %vm681_vm10  ;;  %1424 = vmatpush2.bf16.msk.msra.mxu0 %vm1423_vm12, %v1741_v36  ;;  %1488 = vmatpush2.bf16.msk.msra.mxu1 %vm1423_vm12, %v1741_v36  ;;  %vm548_vm10 = vcmp.gt.f32.partialorder %v446_v16, %v1921_v41 }
 0x1d0   : > { %vm809_vm0 = vmor %vm549_vm3, %vm745_vm13  ;;  %vm679_vm3 = vcmp.lt.s32.totalorder %v245_v19, %v2504_v48 }
 0x1d1   : > { %v451_v18 = vpop.permute.xlu1 %450 }
 0x1d2   : > { %vm551_vm15 = vcmp.gt.f32.partialorder %v451_v18, %v1917_v40  ;;  %vm615_vm14 = vcmp.eq.f32.partialorder %v451_v18, %v1917_v40  ;;  %vm550_vm5 = vcmp.gt.f32.partialorder %v451_v18, %v1921_v41  ;;  %v1144_v18 = vsub.s32 %v1141_v10, %v1885_v2 }
 0x1d3   : > { %vm747_vm6 = vmand %vm615_vm14, %vm683_vm8 }
 0x1d4   : > { %vm811_vm11 = vmor %vm551_vm15, %vm747_vm6 }
 0x1d5   : > { %v436_v20 = vpop.permute.xlu1 %435  ;;  %vm1425_vm1 = vmpackc.low %vm811_vm11, %vm809_vm0 }
 0x1d6   : > { %vm609_vm7 = vcmp.eq.f32.partialorder %v436_v20, %v1917_v40  ;;  %1426 = vmatprep.subr.msk.bf16.mxu0 %vm1425_vm1, %v1741_v36  ;;  %1490 = vmatprep.subr.msk.bf16.mxu1 %vm1425_vm1, %v1741_v36  ;;  %vm1427_vm9 = vmpackc.low %vm550_vm5, %vm548_vm10  ;;  %vm545_vm4 = vcmp.gt.f32.partialorder %v436_v20, %v1917_v40  ;;  %vm673_vm5 = vcmp.lt.s32.totalorder %v242_v21, %v2504_v48 }
 0x1d7   : > { %vm741_vm12 = vmand %vm609_vm7, %vm677_vm2  ;;  %1428 = vmatpush2.bf16.msk.msra.mxu0 %vm1427_vm9, %v1741_v36  ;;  %1492 = vmatpush2.bf16.msk.msra.mxu1 %vm1427_vm9, %v1741_v36  ;;  %vm544_vm2 = vcmp.gt.f32.partialorder %v436_v20, %v1921_v41  ;;  %v1135_v20 = vmax.f32 %v1913_v38, 0.0 }
 0x1d8   : > { %vm805_vm15 = vmor %vm545_vm4, %vm741_vm12  ;;  %vm675_vm4 = vcmp.lt.s32.totalorder %v243_v23, %v2504_v48 }
 0x1d9   : > { %v441_v22 = vpop.permute.xlu1 %440 }
 0x1da   : > { %vm547_vm13 = vcmp.gt.f32.partialorder %v441_v22, %v1917_v40  ;;  %vm611_vm8 = vcmp.eq.f32.partialorder %v441_v22, %v1917_v40  ;;  %vm546_vm14 = vcmp.gt.f32.partialorder %v441_v22, %v1921_v41 }
 0x1db   : > { %vm743_vm0 = vmand %vm611_vm8, %vm679_vm3 }
 0x1dc   : > { %vm807_vm6 = vmor %vm547_vm13, %vm743_vm0 }
 0x1dd   : > { %v426_v24 = vpop.permute.xlu1 %425  ;;  %vm1429_vm11 = vmpackc.low %vm807_vm6, %vm805_vm15 }
 0x1de   : > { %vm605_vm10 = vcmp.eq.f32.partialorder %v426_v24, %v1917_v40  ;;  %1430 = vmatprep.subr.msk.bf16.mxu0 %vm1429_vm11, %v1741_v36  ;;  %1494 = vmatprep.subr.msk.bf16.mxu1 %vm1429_vm11, %v1741_v36  ;;  %vm1431_vm1 = vmpackc.low %vm546_vm14, %vm544_vm2  ;;  %vm541_vm7 = vcmp.gt.f32.partialorder %v426_v24, %v1917_v40  ;;  %vm669_vm14 = vcmp.lt.s32.totalorder %v240_v25, %v2504_v48 }
 0x1df   : > { %vm737_vm9 = vmand %vm605_vm10, %vm673_vm5  ;;  %1432 = vmatpush2.bf16.msk.msra.mxu0 %vm1431_vm1, %v1741_v36  ;;  %1496 = vmatpush2.bf16.msk.msra.mxu1 %vm1431_vm1, %v1741_v36  ;;  %vm540_vm5 = vcmp.gt.f32.partialorder %v426_v24, %v1921_v41 }
 0x1e0   : > { %vm801_vm13 = vmor %vm541_vm7, %vm737_vm9  ;;  %vm671_vm7 = vcmp.lt.s32.totalorder %v241_v27, %v2504_v48 }
 0x1e1   : > { %v431_v26 = vpop.permute.xlu1 %430 }
 0x1e2   : > { %vm543_vm12 = vcmp.gt.f32.partialorder %v431_v26, %v1917_v40  ;;  %vm607_vm3 = vcmp.eq.f32.partialorder %v431_v26, %v1917_v40  ;;  %vm542_vm8 = vcmp.gt.f32.partialorder %v431_v26, %v1921_v41 }
 0x1e3   : > { %vm739_vm15 = vmand %vm607_vm3, %vm675_vm4 }
 0x1e4   : > { %vm803_vm0 = vmor %vm543_vm12, %vm739_vm15 }
 0x1e5   : > { %v416_v28 = vpop.permute.xlu1 %415  ;;  %vm1433_vm6 = vmpackc.low %vm803_vm0, %vm801_vm13 }
 0x1e6   : > { %vm601_vm2 = vcmp.eq.f32.partialorder %v416_v28, %v1917_v40  ;;  %1434 = vmatprep.subr.msk.bf16.mxu0 %vm1433_vm6, %v1741_v36  ;;  %1498 = vmatprep.subr.msk.bf16.mxu1 %vm1433_vm6, %v1741_v36  ;;  %vm1435_vm11 = vmpackc.low %vm542_vm8, %vm540_vm5  ;;  %vm537_vm10 = vcmp.gt.f32.partialorder %v416_v28, %v1917_v40  ;;  %vm536_vm15 = vcmp.gt.f32.partialorder %v416_v28, %v1921_v41 }
 0x1e7   : > { %vm733_vm1 = vmand %vm601_vm2, %vm669_vm14  ;;  %1436 = vmatpush2.bf16.msk.msra.mxu0 %vm1435_vm11, %v1741_v36  ;;  %1500 = vmatpush2.bf16.msk.msra.mxu1 %vm1435_vm11, %v1741_v36  ;;  %vm2864_vm2 = vcmask 1040384  }
 0x1e8   : > { %vm797_vm12 = vmor %vm537_vm10, %vm733_vm1 }
 0x1e9   : > { %v421_v29 = vpop.permute.xlu1 %420  ;;  %vm2865_vm11 = vmmov %vm2864_vm2 }
 0x1ea   : > { %vm539_vm9 = vcmp.gt.f32.partialorder %v421_v29, %v1917_v40  ;;  %vm603_vm4 = vcmp.eq.f32.partialorder %v421_v29, %v1917_v40  ;;  %vm538_vm3 = vcmp.gt.f32.partialorder %v421_v29, %v1921_v41  ;;  %v219_v40 = vld [vmem:[%s1878_s16] sm:$0x3] }
 0x1eb   : > { %vm735_vm13 = vmand %vm603_vm4, %vm671_vm7  ;;  %v1094_v31 = vrot.slane %v219_v40, %v1888_v3  ;;  %v1098_v39 = vrot.slane %v219_v40, %v1893_v6 }
 0x1ec   : > { %vm799_vm8 = vmor %vm539_vm9, %vm735_vm13 }
 0x1ed   : > { %vm1437_vm14 = vmpackc.low %vm799_vm8, %vm797_vm12 }
 0x1ee   : > { %1438 = vmatprep.subr.msk.bf16.mxu0 %vm1437_vm14, %v1741_v36  ;;  %1502 = vmatprep.subr.msk.bf16.mxu1 %vm1437_vm14, %v1741_v36  ;;  %vm1439_vm0 = vmpackc.low %vm538_vm3, %vm536_vm15 }
 0x1ef   : > { %1440 = vmatpush2.bf16.msk.msra.mxu0 %vm1439_vm0, %v1741_v36  ;;  %1504 = vmatpush2.bf16.msk.msra.mxu1 %vm1439_vm0, %v1741_v36 }
 0x1f2   : > { %1021 = vmatmul.mubr.bf16.vlgmr.msra.gmra.mxu0 %v1740_v15  ;;  %1075 = vmatmul.mubr.bf16.vlgmr.msra.gmra.mxu1 %v1040_v30 }
 0x21f   : > { %v1088_v41 = vpop.xlane.xlu1 %1087 }
 0x2b2   : > { %v1022_v32 = vpop.f32.mrf.mxu0  ;;  %v1076_v33 = vpop.f32.mrf.mxu1 }
 0x2b3   : > { %v1103_v34 = vadd.f32 1.0, %v1022_v32  ;;  %v1119_v35 = vadd.f32 %v1088_v41, %v1022_v32  ;;  %v1101_v37 = vadd.f32 %v1094_v31, %v1076_v33  ;;  %v1117_v48 = vsub.f32 %v1088_v41, %v1076_v33 }
 0x2b4   : > { %v1024_v43 = vpop.f32.mrf.mxu0  ;;  %v1078_v44 = vpop.f32.mrf.mxu1  ;;  %vm1129_vm5 = vcmp.ge.f32.partialorder %v1022_v32, 1.0 }
 0x2b5   : > { %v1107_v45 = vadd.f32 %v1103_v34, %v1088_v41  ;;  %v1121_v46 = vsub.f32 %v1119_v35, %v1076_v33  ;;  %v1104_v49 = vadd.f32 1.0, %v1024_v43  ;;  %v1120_v36 = vadd.f32 %v1088_v41, %v1024_v43 }
 0x2b6   : > { %v1026_v50 = vpop.f32.mrf.mxu0  ;;  %v1080_v15 = vpop.f32.mrf.mxu1  ;;  %v1102_v0 = vadd.f32 %v1098_v39, %v1078_v44  ;;  %v1105_v55 = vsub.f32 %v1088_v41, %v1101_v37  ;;  %v1118_v53 = vsub.f32 %v1088_v41, %v1078_v44  ;;  %vm1130_vm6 = vcmp.ge.f32.partialorder %v1024_v43, 1.0 }
 0x2b7   : > { %v1109_v51 = vsub.f32 %v1107_v45, %v1101_v37  ;;  %1587 = vrcp.f32 %v1121_v46  ;;  %v1108_v54 = vadd.f32 %v1104_v49, %v1088_v41  ;;  %v1122_v61 = vsub.f32 %v1120_v36, %v1078_v44 }
 0x2b8   : > { %v1027_v62 = vpop.f32.mrf.mxu0  ;;  %v1081_v63 = vpop.f32.mrf.mxu1  ;;  %v1106_v4 = vsub.f32 %v1088_v41, %v1102_v0 }
 0x2b9   : > { %1589 = vrcp.f32 %v1109_v51  ;;  %v1110_v57 = vsub.f32 %v1108_v54, %v1102_v0 }
 0x2ba   : > { %1591 = vrcp.f32 %v1122_v61 }
 0x2bb   : > { %1593 = vrcp.f32 %v1110_v57 }
 0x2c4   : > { %v1588_v47 = vpop.eup %1587 }
 0x2c5   : > { %v1124_v56 = vmul.f32 %v1588_v47, %v1117_v48 }
 0x2c6   : > { %v1590_v42 = vpop.eup %1589 }
 0x2c7   : > { %v1592_v59 = vpop.eup %1591  ;;  %v1112_v60 = vmul.f32 %v1590_v42, %v1105_v55  ;;  %v1127_v1 = vsub.f32 1.0, %v1124_v56 }
 0x2c8   : > { %v1594_v5 = vpop.eup %1593  ;;  %v1126_v7 = vmul.f32 %v1592_v59, %v1118_v53 }
 0x2c9   : > { %v1115_v8 = vsub.f32 1.0, %v1112_v60  ;;  %v1114_v9 = vmul.f32 %v1594_v5, %v1106_v4  ;;  %v1131_v11 = vsel %vm1129_vm5, %v1127_v1, 0.0 }
 0x2ca   : > { %v1128_v12 = vsub.f32 1.0, %v1126_v7 }
 0x2cb   : > { %v1116_v13 = vsub.f32 1.0, %v1114_v9  ;;  %v1133_v16 = vsub.f32 %v1115_v8, %v1131_v11 }
 0x2cc   : > { %v1132_v14 = vsel %vm1130_vm6, %v1128_v12, 0.0 }
 0x2cd   : > { %v1134_v17 = vsub.f32 %v1116_v13, %v1132_v14 }
 0x2cf   : > { %v1138_v19 = vcombine.low %v1133_v16, %v1134_v17 }
 0x2d1   : > { %v1145_v21 = vrot.slane %v1138_v19, %v1144_v18 }
 0x2d3   : > { %v1152_v22 = vrot.slane %v1145_v21, %v1144_v18 }
 0x2d5   : > { %v1154_v23 = vmul.f32 %v1152_v22, %v1135_v20 }
 0x2d7   : > { %v1159_v24 = vrot.slane %v1154_v23, %v1888_v3  ;;  %v1163_v25 = vrot.slane %v1154_v23, %v1893_v6 }
 0x2d9   : > { %v1166_v26 = vsel %vm2864_vm2, %v1159_v24, 0.0  ;;  %v1167_v27 = vsel %vm2865_vm11, %v1163_v25, 0.0 }
 0x2da   : > { %v1168_v28 = vadd.f32 %v1167_v27, %v1166_v26 }
 0x2dc   : > { %1169 = vadd.xlane.f32.xlu1 %v1168_v28 }
 0x365   : > { %v1170_v29 = vpop.xlane.xlu1 %1169 }
 0x366   : > { %v1171_v2 = vrot.slane %v1170_v29, 4 }
 0x368   : > { %v1172_v30 = vadd.f32 %v1171_v2, %v1170_v29 }
 0x36a   : > { %v1173_v38 = vrot.slane %v1172_v30, 2 }
 0x36c   : > { %v1174_v40 = vadd.f32 %v1173_v38, %v1172_v30 }
 0x36e   : > { %v1175_v31 = vrot.slane %v1174_v40, 1 }
 0x370   : > { %v1176_v41 = vadd.f32 %v1175_v31, %v1174_v40 }
 0x372   : > { %1511 = vpush %v1176_v41 }
 0x3a3   : > { %s1512_s28 = spop %1511 }
 0x3a4   : > { %v1178_v3 = vstv %s1512_s28 }
 0x3a5   : > { %1179 = vst [vmem:[%s211_s18] sm:$0xff] %v1178_v3 }
 0x3a6   : > { %1664 = shalt.err (!%p1661_p6)
}
 0x3a7   : > { %s1665_s26 = scalar_lea.hbm %s1193_s7, 128  ;;  %s1669_s15 = scalar_lea.hbm %s2691_s2, 256 }
 0x3a8   : > { %p1666_p7 = scmp.ne.s32.totalorder %s1193_s7, %s1665_s26  ;;  %p1670_p4 = scmp.lt.s32.totalorder %s1193_s7, %s2691_s2 }
 0x3a9   : > { %p1671_p10 = scmp.lt.s32.totalorder %s1669_s15, %s1665_s26 }
 0x3aa   : > { %p1667_p1 = pnand %p1666_p7, %p1810_p9 }
 0x3ab   : > { %p1672_p8 = por %p1671_p10, %p1670_p4 }
 0x3ac   : > { %p1668_p2 = pneg %p1667_p1 }
 0x3ae   : > { %p1673_p0 = pnand %p1672_p8, %p1668_p2 }
 0x3b0   : > { %1676 = shalt.err (!%p1673_p0)
}
 0x3b1   : > { %1517 = dma.vmem_to_hbm [thread:$0]  (%p1810_p9), %s2644_s19, 128, %s1193_s7, %s1181_s8  }
 0x3b2 PF: > { %s1207_s21 = sand.u32 1, %s1715_s9   ;;  %p2866_p3 = scmp.ge.s32.totalorder %s1735_s14, 2 }
 0x3b3   : > { %s1208_s18 = scalar_lea.sflag [#allocation4], %s1207_s21 }
 0x3b4   : > { %p1527_p13 = pnand %p2866_p3, %p1817_p11 }
 0x3b6   : > { %p1528_p5 = pneg %p1527_p13 }
 0x3b8   : > { %1710 = dma.done.wait (%p1528_p5), %s1208_s18, 128  }
 0x3b9   : > { %1712 = vsyncadd (%p1528_p5), %s1208_s18, 4294967168  ;;  %s21_s14 = sadd.s32 1, %s1735_s14   ;;  %s2867_s9 = smov %s1719_s10 }
 0x3ba   : > { %p18_p12 = scmp.ge.s32.totalorder %s21_s14, 4   ;;  %s2868_s10 = smov %s1723_s11 }
 0x3bb   : > { %s2869_s11 = smov %s1815_s23  ;;  %s2870_s12 = smov %s1731_s13 }
 0x3bc   : > { %s2871_s13 = smov %s2873_s17  ;;  %20 = sbr.rel (!%p18_p12) target bundleno = 8 (0x8), region = 88 }
 0x3c1   :  { %1213 = vsyncpa [#allocation3], 1 }
 0x3c2   :  { %1215 = vsyncpa [#allocation3 + $0x1], 1 }
 0x3c3   :  { %1216 = vsyncpa [#allocation6], 1 }
 0x3c4   :  { %1218 = vsyncpa [#allocation6 + $0x1], 1 }
 0x3c5   :  { %1219 = vsyncpa [#allocation4], 1 }
 0x3c6   :  { %1221 = vsyncpa [#allocation4 + $0x1], 1 }

</bundles_post_ra>
